<compile_context>
chip_gen: v7x
topology: tpu7x:2x2x1
jax: 0.10.0
libtpu: 0.0.40
codegen_flags: <defaults>
</compile_context>

<pallas_src>
import functools

import jax
import jax.numpy as jnp
import numpy as np
from jax import lax
from jax.experimental import pallas as pl
from jax.experimental.pallas import tpu as pltpu

# Large finite negative for masking (safer than -inf: no inf-inf=NaN risk).
_MASK_VALUE = -0.5 * float(np.finfo(np.float32).max)
_LANE = 128
_SUBLANE = 8


def _round_up(x: int, m: int) -> int:
    return ((x + m - 1) // m) * m


def _vmem_capacity_bytes() -> int:
    """Physical VMEM of the attached chip; conservative fallback off-TPU."""
    try:
        return int(pltpu.get_tpu_info().vmem_capacity_bytes)
    except Exception:
        return 64 * 1024 * 1024  # v7x-sized conservative default


def _choose_tiling(b: int, dp: int, itemsize: int, vmem_cap: int):
    """Pick (row tile tq, padded batch bp) so the whole pipeline fits VMEM."""
    budget = int(vmem_cap * 0.7)

    def fits(tq, bp):
        need = 2 * (2 * bp) * dp * itemsize   # resident keys (double-buffered worst case)
        need += 4 * tq * (2 * bp) * 4         # live f32 sims / exp temporaries (one half + slack)
        need += 2 << 20                       # ids, outputs, misc slack
        return need <= budget

    b8 = _round_up(b, _SUBLANE)
    # Small batches: a single 8-aligned tile, no batch padding beyond sublanes.
    if b8 <= 256 and fits(b8, b8):
        return b8, b8
    # Larger batches: MXU-friendly row tiles, batch padded to a tile multiple,
    # tile shrunk until the pipeline fits this generation's VMEM.
    for tq in (512, 256, 128, 64, 32, 16, 8):
        if tq > b8:
            continue
        bp = _round_up(b, tq)
        if fits(tq, bp):
            return tq, bp
    # TODO(synk): very large B (keys alone > VMEM) needs a column-tiled,
    # flash-style online LSE; fall back to the smallest row tile here.
    return 8, _round_up(b, 8)


def _make_nce_kernel(temperature: float, use_intent: bool, tq: int,
                     b: int, bp: int, cast_queries: bool):
    """All closed-over values are Python scalars -> nothing is captured as a tracer."""
    inv_t = 1.0 / float(temperature)
    two_bp = 2 * bp
    pad_rows = bp > b
    # Contract the hidden dim of both operands (A @ K^T).  This is the standard
    # flash-attention q.k^T form; Mosaic lowers it on the MXU without
    # materializing a transposed copy of the (2bp, Dp) keys.
    dn = (((1,), (1,)), ((), ()))

    def _lse(s):  # row-wise log-sum-exp, (tq, 2bp) -> (tq, 1)
        m = jnp.max(s, axis=-1, keepdims=True)
        return jnp.log(jnp.sum(jnp.exp(s - m), axis=-1, keepdims=True)) + m

    def kernel(*refs):
        if use_intent:
            k_ref, ic_ref, ir_ref, out_ref = refs
        else:
            k_ref, out_ref = refs

        i = pl.program_id(0)
        row0 = pl.multiple_of(i * tq, tq)

        x2t = k_ref[pl.ds(row0, tq), :]        # (tq, Dp) rows of sample two (K top half)
        x1t = k_ref[pl.ds(bp + row0, tq), :]   # (tq, Dp) rows of sample one (K bottom half)
        keys = k_ref[...]                      # (2*bp, Dp) resident keys [x2; x1]

        gr = lax.broadcasted_iota(jnp.int32, (tq, two_bp), 0) + i * tq   # global row
        col = lax.broadcasted_iota(jnp.int32, (tq, two_bp), 1)
        diag_left = col == gr          # correct-logit column for the "top" rows
        diag_right = col == gr + bp    # correct-logit column for the "bottom" rows

        if pad_rows:
            # Zero-padded key rows live at columns [b, bp) and [bp+b, 2bp).
            col_pad = ((col >= b) & (col < bp)) | (col >= bp + b)

        if use_intent:
            # (tq,1) == (1,2bp) -> (tq,2bp); key ids are [ids, ids].
            eq = ic_ref[pl.ds(row0, tq), :] == ir_ref[...]
            mask_top = eq & jnp.logical_not(diag_left)    # sim12 off-diag + sim11 (eq)
            mask_bot = eq & jnp.logical_not(diag_right)   # sim22 (eq) + sim12^T off-diag
        else:
            mask_top = diag_right                          # diag of sim11
            mask_bot = diag_left                           # diag of sim22
        if pad_rows:
            mask_top = mask_top | col_pad
            mask_bot = mask_bot | col_pad

        # ---- top half: rows use x1 as query;  [sim12 | sim11] ----
        s_top = lax.dot_general(x1t, keys, dn,
                                preferred_element_type=jnp.float32) * inv_t
        s_top = jnp.where(mask_top, _MASK_VALUE, s_top)
        lse_top = _lse(s_top)                               # (tq, 1); s_top dies here

        # ---- bottom half: rows use x2 as query;  [sim22 | sim12^T] ----
        s_bot = lax.dot_general(x2t, keys, dn,
                                preferred_element_type=jnp.float32) * inv_t
        s_bot = jnp.where(mask_bot, _MASK_VALUE, s_bot)
        lse_bot = _lse(s_bot)

        # Target logit of row q in BOTH halves is sim12[q, q] = <x1_q, x2_q>/t.
        if cast_queries:
            prod = x1t.astype(jnp.float32) * x2t.astype(jnp.float32)
        else:
            prod = x1t * x2t
        correct = jnp.sum(prod, axis=-1, keepdims=True) * inv_t   # (tq, 1)

        per_row = (lse_top - correct) + (lse_bot - correct)       # (tq, 1)
        if pad_rows:
            rv = (lax.broadcasted_iota(jnp.int32, (tq, 1), 0) + i * tq) < b
            per_row = jnp.where(rv, per_row, 0.0)

        out_ref[0, 0] = jnp.sum(per_row)    # per-tile partial sum (no accumulation)

    return kernel


@functools.partial(jax.jit, static_argnames=("temperature", "compute_dtype"))
def _nce_loss_impl(batch_sample_one, batch_sample_two, intent_ids, *,
                   temperature, compute_dtype=None):
    b, d = batch_sample_one.shape
    use_intent = intent_ids is not None

    x1, x2 = batch_sample_one, batch_sample_two
    if compute_dtype is not None:            # e.g. jnp.bfloat16 for the MXU on v5e/v6e/v7x
        x1 = x1.astype(compute_dtype)
        x2 = x2.astype(compute_dtype)

    # Pad hidden dim to a multiple of 128 lanes (zero padding never changes a
    # dot product) so every VMEM block is lane-dense.
    dp = max(_LANE, _round_up(d, _LANE))
    itemsize = jnp.dtype(x1.dtype).itemsize
    vmem_cap = _vmem_capacity_bytes()
    tq, bp = _choose_tiling(b, dp, itemsize, vmem_cap)
    num_tiles = bp // tq

    # One resident key matrix K = [x2; x1] (2*bp, Dp).  Padded key columns are
    # masked out of the LSE and padded query rows are dropped from the loss
    # inside the kernel.
    pad = ((0, bp - b), (0, dp - d))
    x1p = jnp.pad(x1, pad)
    x2p = jnp.pad(x2, pad)
    keys = jnp.concatenate([x2p, x1p], axis=0)               # (2*bp, Dp)

    cast_queries = keys.dtype != jnp.float32
    kernel = _make_nce_kernel(temperature, use_intent, tq, b, bp, cast_queries)

    inputs = [keys]
    # NOTE: the resident blocks are grid-invariant; the VMEM budget above
    # conservatively assumes the default double buffer for them.
    in_specs = [pl.BlockSpec((2 * bp, dp), lambda i: (0, 0))]
    if use_intent:
        ids = intent_ids.reshape(-1).astype(jnp.int32)
        ids = jnp.pad(ids, (0, bp - b), constant_values=-1)
        inputs.append(ids.reshape(bp, 1))                               # query-row ids
        inputs.append(jnp.concatenate([ids, ids]).reshape(1, 2 * bp))   # key-column ids
        in_specs.append(pl.BlockSpec((bp, 1), lambda i: (0, 0)))
        in_specs.append(pl.BlockSpec((1, 2 * bp), lambda i: (0, 0)))

    # VMEM request sized from this chip's capacity (v5e/v6e 128 MiB, v7x 64 MiB).
    est = 2 * (2 * bp) * dp * itemsize + 4 * tq * (2 * bp) * 4 + (2 << 20)
    vmem_limit = int(max(min(vmem_cap - (8 << 20), max(est, 16 << 20)), 4 << 20))

    cost = pl.CostEstimate(
        flops=8 * bp * bp * dp,                   # two (tq,Dp)x(Dp,2bp) matmuls per tile
        transcendentals=4 * bp * bp,              # exps over both halves
        bytes_accessed=(2 * bp) * dp * itemsize   # resident keys, read once
        + (3 * bp * 4 if use_intent else 0)
        + num_tiles * 4,
    )

    partial = pl.pallas_call(
        kernel,
        out_shape=jax.ShapeDtypeStruct((num_tiles, 1), jnp.float32),
        grid=(num_tiles,),
        in_specs=in_specs,
        out_specs=pl.BlockSpec((1, 1), lambda i: (i, 0),
                               memory_space=pltpu.MemorySpace.SMEM),
        compiler_params=pltpu.CompilerParams(
            # Per-tile partial sums -> independent output blocks -> safe to
            # shard the row-tile axis across v7x's two TensorCores.
            dimension_semantics=("parallel",),
            vmem_limit_bytes=vmem_limit,
        ),
        cost_estimate=cost,
    )(*inputs)

    # Tiny JAX epilogue: sum the per-tile partials, mean over the 2B real rows.
    return jnp.sum(partial) / (2.0 * b)


def nce_loss(batch_sample_one, batch_sample_two, intent_ids=None, *,
             temperature=1.0, compute_dtype=None):
    """Pallas implementation of NCELoss.forward (temperature is an __init__ hyperparam)."""
    return _nce_loss_impl(batch_sample_one, batch_sample_two, intent_ids,
                          temperature=float(temperature),
                          compute_dtype=compute_dtype)


def _nce_loss_ref(x1, x2, intent_ids, temperature):
    """Pure-JAX reference mirroring the PyTorch module."""
    sim11 = x1 @ x1.T / temperature
    sim22 = x2 @ x2.T / temperature
    sim12 = x1 @ x2.T / temperature
    b = sim12.shape[-1]
    eye = jnp.eye(b, dtype=bool)
    if intent_ids is not None:
        ids = intent_ids.reshape(-1, 1)
        eq = ids == ids.T
        sim11 = jnp.where(eq, -jnp.inf, sim11)
        sim22 = jnp.where(eq, -jnp.inf, sim22)
        sim12 = jnp.where(eq & ~eye, -jnp.inf, sim12)
    else:
        sim11 = jnp.where(eye, -jnp.inf, sim11)
        sim22 = jnp.where(eye, -jnp.inf, sim22)
    logits = jnp.concatenate(
        [jnp.concatenate([sim12, sim11], axis=-1),
         jnp.concatenate([sim22, sim12.T], axis=-1)], axis=0)
    labels = jnp.arange(2 * b)
    logp = jax.nn.log_softmax(logits, axis=-1)
    return -jnp.mean(logp[jnp.arange(2 * b), labels])


if __name__ == "__main__":
    # Use full-precision f32 matmuls in BOTH the kernel and the reference so
    # the comparison is meaningful on real TPU hardware.
    jax.config.update("jax_default_matmul_precision", "highest")

    temperature = 0.5

    def check(b, d, with_intent, k):
        k1, k2, k3 = jax.random.split(k, 3)
        x1 = jax.random.normal(k1, (b, d), dtype=jnp.float32)
        x2 = jax.random.normal(k2, (b, d), dtype=jnp.float32)
        ids = (jax.random.randint(k3, (b,), 0, 3, dtype=jnp.int32)
               if with_intent else None)
        got = nce_loss(x1, x2, ids, temperature=temperature)
        jax.block_until_ready(got)
        want = _nce_loss_ref(x1, x2, ids, temperature)
        np.testing.assert_allclose(np.asarray(got), np.asarray(want),
                                   rtol=1e-4, atol=1e-4)

    keys = jax.random.split(jax.random.PRNGKey(0), 4)
    check(8, 32, False, keys[0])    # single tile, no padding, eye mask
    check(8, 32, True, keys[1])     # single tile, intent mask
    check(12, 40, True, keys[2])    # padded batch rows + padded hidden dim
    check(264, 48, True, keys[3])   # multi-tile grid with row/column padding

    print("KERNEL_OK")
</pallas_src>

<mosaic_0001>
module attributes {stable_mosaic.version = 11 : i64} {
  func.func @kernel(%arg0: i32, %arg1: memref<16x128xf32, #tpu.memory_space<vmem>>, %arg2: memref<1x1xf32, #tpu.memory_space<smem>>) attributes {dimension_semantics = [#tpu.dimension_semantics<parallel>], iteration_bounds = array<i64: 1>, scalar_prefetch = 0 : i64, scratch_operands = 0 : i64, tpu.core_type = #tpu.core_type<tc>, window_params = [{pipeline_mode = #tpu.pipeline_mode<synchronous>, transform_indices = @transform_0, window_bounds = array<i64: 16, 128>}, {transform_indices = @transform_1, window_bounds = array<i64: 1, 1>}]} {
    %c8_i32 = arith.constant 8 : i32
    %0 = arith.muli %arg0, %c8_i32 : i32
    %1 = tpu.assume_multiple %0, 8 : i32
    %2 = arith.index_cast %1 : i32 to index
    %c0 = arith.constant 0 : index
    %3 = vector.load %arg1[%2, %c0] : memref<16x128xf32, #tpu.memory_space<vmem>>, vector<8x128xf32>
    %c8_i32_0 = arith.constant 8 : i32
    %4 = arith.addi %c8_i32_0, %1 : i32
    %5 = arith.index_cast %4 : i32 to index
    %c0_1 = arith.constant 0 : index
    %6 = vector.load %arg1[%5, %c0_1] : memref<16x128xf32, #tpu.memory_space<vmem>>, vector<8x128xf32>
    %c0_2 = arith.constant 0 : index
    %c0_3 = arith.constant 0 : index
    %7 = vector.load %arg1[%c0_2, %c0_3] : memref<16x128xf32, #tpu.memory_space<vmem>>, vector<16x128xf32>
    %8 = tpu.iota {dimensions = array<i32: 0>} : vector<8x16xi32>
    %c8_i32_4 = arith.constant 8 : i32
    %9 = arith.muli %arg0, %c8_i32_4 : i32
    %10 = vector.broadcast %9 : i32 to vector<8x16xi32>
    %11 = arith.addi %8, %10 : vector<8x16xi32>
    %12 = tpu.iota {dimensions = array<i32: 1>} : vector<8x16xi32>
    %13 = arith.cmpi eq, %12, %11 : vector<8x16xi32>
    %c8_i32_5 = arith.constant 8 : i32
    %14 = vector.broadcast %c8_i32_5 : i32 to vector<8x16xi32>
    %15 = arith.addi %11, %14 : vector<8x16xi32>
    %16 = arith.cmpi eq, %12, %15 : vector<8x16xi32>
    %cst = arith.constant dense<0.000000e+00> : vector<8x16xf32>
    %17 = tpu.matmul %6, %7, %cst {dimension_numbers = #tpu.dot_dimension_numbers<[1], [1], [0], [0], [0, 0, 1, 0], [], []>, precision = #tpu.contract_precision<fp32>} : vector<8x128xf32>, vector<16x128xf32>, vector<8x16xf32> -> vector<8x16xf32>
    %cst_6 = arith.constant 2.000000e+00 : f32
    %18 = vector.broadcast %cst_6 : f32 to vector<8x16xf32>
    %19 = arith.mulf %17, %18 : vector<8x16xf32>
    %cst_7 = arith.constant -1.70141173E+38 : f32
    %20 = vector.broadcast %cst_7 : f32 to vector<8x16xf32>
    %21 = arith.select %16, %20, %19 : vector<8x16xi1>, vector<8x16xf32>
    %cst_8 = arith.constant dense<0xFF800000> : vector<8xf32>
    %22 = vector.multi_reduction <maximumf>, %21, %cst_8 [1] : vector<8x16xf32> to vector<8xf32>
    %23 = vector.shape_cast %22 : vector<8xf32> to vector<8x1xf32>
    %24 = vector.broadcast %23 : vector<8x1xf32> to vector<8x16xf32>
    %25 = arith.subf %21, %24 : vector<8x16xf32>
    %26 = math.exp %25 : vector<8x16xf32>
    %cst_9 = arith.constant dense<0.000000e+00> : vector<8xf32>
    %27 = vector.multi_reduction <add>, %26, %cst_9 [1] : vector<8x16xf32> to vector<8xf32>
    %28 = vector.shape_cast %27 : vector<8xf32> to vector<8x1xf32>
    %29 = math.log %28 : vector<8x1xf32>
    %30 = arith.addf %29, %23 : vector<8x1xf32>
    %cst_10 = arith.constant dense<0.000000e+00> : vector<8x16xf32>
    %31 = tpu.matmul %3, %7, %cst_10 {dimension_numbers = #tpu.dot_dimension_numbers<[1], [1], [0], [0], [0, 0, 1, 0], [], []>, precision = #tpu.contract_precision<fp32>} : vector<8x128xf32>, vector<16x128xf32>, vector<8x16xf32> -> vector<8x16xf32>
    %cst_11 = arith.constant 2.000000e+00 : f32
    %32 = vector.broadcast %cst_11 : f32 to vector<8x16xf32>
    %33 = arith.mulf %31, %32 : vector<8x16xf32>
    %cst_12 = arith.constant -1.70141173E+38 : f32
    %34 = vector.broadcast %cst_12 : f32 to vector<8x16xf32>
    %35 = arith.select %13, %34, %33 : vector<8x16xi1>, vector<8x16xf32>
    %cst_13 = arith.constant dense<0xFF800000> : vector<8xf32>
    %36 = vector.multi_reduction <maximumf>, %35, %cst_13 [1] : vector<8x16xf32> to vector<8xf32>
    %37 = vector.shape_cast %36 : vector<8xf32> to vector<8x1xf32>
    %38 = vector.broadcast %37 : vector<8x1xf32> to vector<8x16xf32>
    %39 = arith.subf %35, %38 : vector<8x16xf32>
    %40 = math.exp %39 : vector<8x16xf32>
    %cst_14 = arith.constant dense<0.000000e+00> : vector<8xf32>
    %41 = vector.multi_reduction <add>, %40, %cst_14 [1] : vector<8x16xf32> to vector<8xf32>
    %42 = vector.shape_cast %41 : vector<8xf32> to vector<8x1xf32>
    %43 = math.log %42 : vector<8x1xf32>
    %44 = arith.addf %43, %37 : vector<8x1xf32>
    %45 = arith.mulf %6, %3 : vector<8x128xf32>
    %cst_15 = arith.constant dense<0.000000e+00> : vector<8xf32>
    %46 = vector.multi_reduction <add>, %45, %cst_15 [1] : vector<8x128xf32> to vector<8xf32>
    %47 = vector.shape_cast %46 : vector<8xf32> to vector<8x1xf32>
    %cst_16 = arith.constant 2.000000e+00 : f32
    %48 = vector.broadcast %cst_16 : f32 to vector<8x1xf32>
    %49 = arith.mulf %47, %48 : vector<8x1xf32>
    %50 = arith.subf %30, %49 : vector<8x1xf32>
    %51 = arith.subf %44, %49 : vector<8x1xf32>
    %52 = arith.addf %50, %51 : vector<8x1xf32>
    %53 = vector.shape_cast %52 : vector<8x1xf32> to vector<1x8x1xf32>
    %cst_17 = arith.constant dense<0.000000e+00> : vector<1xf32>
    %54 = vector.multi_reduction <add>, %53, %cst_17 [1, 2] : vector<1x8x1xf32> to vector<1xf32>
    %55 = vector.shape_cast %54 : vector<1xf32> to vector<1x1x1xf32>
    %56 = vector.extract %55[0, 0, 0] : f32 from vector<1x1x1xf32>
    %c0_18 = arith.constant 0 : index
    %c0_19 = arith.constant 0 : index
    %57 = memref.load %arg2[%c0_18, %c0_19] : memref<1x1xf32, #tpu.memory_space<smem>>
    memref.store %56, %arg2[%c0_18, %c0_19] : memref<1x1xf32, #tpu.memory_space<smem>>
    return
  }
  func.func @transform_0(%arg0: i32) -> (i32, i32) {
    %c0_i32 = arith.constant 0 : i32
    %c0_i32_0 = arith.constant 0 : i32
    %c0_i32_1 = arith.constant 0 : i32
    return %c0_i32, %c0_i32_0 : i32, i32
  }
  func.func @transform_1(%arg0: i32) -> (i32, i32) {
    %c0_i32 = arith.constant 0 : i32
    %c0_i32_0 = arith.constant 0 : i32
    return %arg0, %c0_i32 : i32, i32
  }
}

</mosaic_0001>

<bundles_post_ra>
// kernel: _nce_loss_impl.1
= control target key start
LH: loop header
LB: loop body
LE: loop exit
PB: predicated region body
PF: predicated region fallthrough
CT: control target
= control target key end

     0   :  { %v1210_v2 = vmov 0.0|0.0   ;;  %s1268_s0 = inlined_call_operand.vmem [shape: f32[16,128], index: 0, kind: input, shape index: {}]   ;;  %s1269_s1 = inlined_call_operand.hbm [shape: f32[1,1], index: 1, kind: output, shape index: {}]  }
   0x1   :  { %v1227_v0 = vld [vmem:[%s1268_s0] sm:$0xff]  ;;  %v1232_v1 = vld [vmem:[%s1268_s0 + $0x8] sm:$0xff]  ;;  %1128 = vmatprep.subr.bf16.mxu0 %v1210_v2  ;;  %1146 = vmatprep.subr.bf16.mxu1 %v1210_v2 }
   0x2   :  { %v27_v3 = vand.u32 4294901760, %v1227_v0  ;;  %v30_v4 = vand.u32 4294901760, %v1232_v1 }
   0x3   :  { %6 = vsyncpa [#allocation3], 0  ;;  %vm1211_vm0 = vmmov 0   ;;  %v1212_v5 = vmov 0.0   ;;  %v17_v18 = vlaneseq  ;;  %vm487_vm2 = vcmask 130048   ;;  %s1198_s12 = scalar_lea.hbm %s1269_s1, 16 }
   0x4   :  { %1048 = vmatprep.mubr.msk.f32.mxu0 %vm1211_vm0, %v1212_v5  ;;  %1090 = vmatprep.mubr.msk.f32.mxu1 %vm1211_vm0, %v1212_v5  ;;  %v1129_v6 = vpack.c.bf16 %v30_v4, %v27_v3  ;;  %v94_v7 = vsub.f32 %v1232_v1, %v30_v4  ;;  %v568_v8 = vsub.f32 %v1227_v0, %v27_v3  ;;  %vm980_vm4 = vcmask 7168   ;;  %p1199_p0 = scmp.ne.s32.totalorder %s1269_s1, %s1198_s12  ;;  %p1202_p1 = scmp.lt.u32.totalorder %s1198_s12, %s1269_s1 }
   0x5   :  { %v18_v19 = vshrl.u32 %v17_v18, 7  ;;  %v22_v20 = vand.u32 127, %v17_v18  ;;  %v973_v32 = vmul.f32 %v1232_v1, %v1227_v0 }
   0x6   :  { %1130 = vmatpush3.bf16.xpose.msra.mxu0 %v1129_v6  ;;  %1148 = vmatpush3.bf16.xpose.msra.mxu1 %v1129_v6  ;;  %v95_v9 = vand.u32 4294901760, %v94_v7  ;;  %v569_v10 = vand.u32 4294901760, %v568_v8  ;;  %v1135_v16 = vpack.c.bf16 %v94_v7, %v568_v8  ;;  %p1204_p2 = pnand %p1202_p1, %p1199_p0 }
   0x7   :  { %1131 = vmatprep.subr.bf16.mxu0 %v1210_v2  ;;  %1149 = vmatprep.subr.bf16.mxu1 %v1210_v2  ;;  %v24_v21 = vadd.s32 8, %v18_v19  ;;  %vm23_vm3 = vcmp.eq.s32.totalorder %v22_v20, %v18_v19 }
   0x8   :  { %v96_v11 = vsub.f32 %v94_v7, %v95_v9  ;;  %v570_v12 = vsub.f32 %v568_v8, %v569_v10  ;;  %v1141_v17 = vpack.c.bf16 %v95_v9, %v569_v10 }
   0x9   :  { %vm25_vm1 = vcmp.eq.s32.totalorder %v22_v20, %v24_v21 }
   0xa   :  { %v97_v13 = vand.u32 4294901760, %v96_v11  ;;  %v571_v14 = vand.u32 4294901760, %v570_v12 }
   0xc   :  { %v1132_v15 = vpack.c.bf16 %v97_v13, %v571_v14 }
   0xd   :  { %1049 = vmatmul.mubr.f32.vlgmr.msra.gmra.mrb[0].mxu0 %v97_v13  ;;  %1091 = vmatmul.mubr.f32.vlgmr.msra.gmra.mrb[0].mxu1 %v571_v14 }
   0xe   :  { %1133 = vmatpush3.bf16.xpose.msra.mxu0 %v1132_v15  ;;  %1151 = vmatpush3.bf16.xpose.msra.mxu1 %v1132_v15 }
   0xf   :  { %1055 = vmatprep.mubr.msk.f32.mxu0 %vm1211_vm0, %v1212_v5  ;;  %1097 = vmatprep.mubr.msk.f32.mxu1 %vm1211_vm0, %v1212_v5 }
  0x10   :  { %1134 = vmatprep.subr.bf16.mxu0 %v1210_v2  ;;  %1152 = vmatprep.subr.bf16.mxu1 %v1210_v2 }
  0x15   :  { %1056 = vmatmul.mubr.f32.vlgmr.msra.gmra.mrb[0].mxu0 %v30_v4  ;;  %1098 = vmatmul.mubr.f32.vlgmr.msra.gmra.mrb[0].mxu1 %v27_v3 }
  0x16   :  { %1136 = vmatpush3.bf16.xpose.msra.mxu0 %v1135_v16  ;;  %1154 = vmatpush3.bf16.xpose.msra.mxu1 %v1135_v16 }
  0x17   :  { %1062 = vmatprep.mubr.msk.f32.mxu0 %vm1211_vm0, %v1212_v5  ;;  %1104 = vmatprep.mubr.msk.f32.mxu1 %vm1211_vm0, %v1212_v5 }
  0x18   :  { %1137 = vmatprep.subr.bf16.mxu0 %v1210_v2  ;;  %1155 = vmatprep.subr.bf16.mxu1 %v1210_v2 }
  0x1d   :  { %1063 = vmatmul.mubr.f32.vlgmr.msra.gmra.mrb[0].mxu0 %v94_v7  ;;  %1105 = vmatmul.mubr.f32.vlgmr.msra.gmra.mrb[0].mxu1 %v568_v8 }
  0x1e   :  { %1139 = vmatpush3.bf16.xpose.msra.mxu0 %v1129_v6  ;;  %1157 = vmatpush3.bf16.xpose.msra.mxu1 %v1129_v6 }
  0x1f   :  { %1069 = vmatprep.mubr.msk.f32.mxu0 %vm1211_vm0, %v1212_v5  ;;  %1111 = vmatprep.mubr.msk.f32.mxu1 %vm1211_vm0, %v1212_v5 }
  0x20   :  { %1140 = vmatprep.subr.bf16.mxu0 %v1210_v2  ;;  %1158 = vmatprep.subr.bf16.mxu1 %v1210_v2 }
  0x25   :  { %1070 = vmatmul.mubr.f32.vlgmr.msra.gmra.mrb[0].mxu0 %v95_v9  ;;  %1112 = vmatmul.mubr.f32.vlgmr.msra.gmra.mrb[0].mxu1 %v569_v10 }
  0x26   :  { %1142 = vmatpush3.bf16.xpose.msra.mxu0 %v1141_v17  ;;  %1160 = vmatpush3.bf16.xpose.msra.mxu1 %v1141_v17 }
  0x27   :  { %1076 = vmatprep.mubr.msk.f32.mxu0 %vm1211_vm0, %v1212_v5  ;;  %1118 = vmatprep.mubr.msk.f32.mxu1 %vm1211_vm0, %v1212_v5 }
  0x28   :  { %1143 = vmatprep.subr.bf16.mxu0 %v1210_v2  ;;  %1161 = vmatprep.subr.bf16.mxu1 %v1210_v2 }
  0x2d   :  { %1077 = vmatmul.mubr.f32.vlgmr.msra.gmra.mrb[0].mxu0 %v30_v4  ;;  %1119 = vmatmul.mubr.f32.vlgmr.msra.gmra.mrb[0].mxu1 %v27_v3 }
  0x2e   :  { %1145 = vmatpush3.bf16.xpose.msra.mxu0 %v1129_v6  ;;  %1163 = vmatpush3.bf16.xpose.msra.mxu1 %v1129_v6 }
  0x2f   :  { %1083 = vmatprep.mubr.msk.f32.mxu0 %vm1211_vm0, %v1212_v5  ;;  %1125 = vmatprep.mubr.msk.f32.mxu1 %vm1211_vm0, %v1212_v5 }
  0x35   :  { %1084 = vmatmul.mubr.f32.vlgmr.msra.gmra.mrb[0].mxu0 %v30_v4  ;;  %1126 = vmatmul.mubr.f32.vlgmr.msra.gmra.mrb[0].mxu1 %v27_v3 }
 0x108   :  { %v481_v22 = vpop.f32.mrb[0].mxu0  ;;  %v955_v23 = vpop.f32.mrb[0].mxu1 }
 0x109   :  { %v485_v24 = vmul.f32 2.0, %v481_v22  ;;  %v959_v25 = vmul.f32 2.0, %v955_v23  ;;  %v1085_v26 = vpop.f32.mrb[1].mxu0  ;;  %v1127_v27 = vpop.f32.mrb[1].mxu1 }
 0x10b   :  { %v486_v28 = vsel %vm25_vm1, -1.7014117e+38, %v485_v24  ;;  %v960_v30 = vsel %vm23_vm3, -1.7014117e+38, %v959_v25 }
 0x10c   :  { %v488_v29 = vsel %vm487_vm2, %v486_v28, -inf  ;;  %v961_v31 = vsel %vm487_vm2, %v960_v30, -inf }
 0x10d   :  { %489 = vmax.xlane.f32.xlu0 %v488_v29 }
 0x111   :  { %962 = vmax.xlane.f32.xlu0 %v961_v31 }
 0x115   :  { %974 = vadd.xlane.f32.xlu0 %v973_v32 }
 0x19a   :  { %v490_v33 = vpop.xlane.xlu0 %489 }
 0x19b   :  { %v491_v34 = vsub.f32 %v486_v28, %v490_v33 }
 0x19d   :  { %v492_v35 = vmul.f32 1.442695, %v491_v34 }
 0x19e   :  { %v963_v36 = vpop.xlane.xlu0 %962 }
 0x19f   :  { %1190 = vpow2.f32 %v492_v35  ;;  %v964_v37 = vsub.f32 %v960_v30, %v963_v36 }
 0x1a1   :  { %v965_v38 = vmul.f32 1.442695, %v964_v37 }
 0x1a2   :  { %v975_v47 = vpop.xlane.xlu0 %974 }
 0x1a3   :  { %1192 = vpow2.f32 %v965_v38  ;;  %v976_v51 = vmul.f32 2.0, %v975_v47 }
 0x1a9   :  { %v1191_v39 = vpop.eup %1190 }
 0x1aa   :  { %v494_v40 = vsel %vm487_vm2, %v1191_v39, 0.0 }
 0x1ab   :  { %495 = vadd.xlane.f32.xlu1 %v494_v40 }
 0x1ad   :  { %v1193_v41 = vpop.eup %1192 }
 0x1ae   :  { %v967_v42 = vsel %vm487_vm2, %v1193_v41, 0.0 }
 0x1af   :  { %968 = vadd.xlane.f32.xlu1 %v967_v42 }
 0x238   :  { %v496_v43 = vpop.xlane.xlu1 %495 }
 0x239   :  { %1194 = vlog2.f32 %v496_v43 }
 0x23c   :  { %v969_v44 = vpop.xlane.xlu1 %968 }
 0x23d   :  { %1196 = vlog2.f32 %v969_v44 }
 0x243   :  { %v1195_v45 = vpop.eup %1194 }
 0x244   :  { %v498_v46 = vmul.f32 0.6931472, %v1195_v45 }
 0x246   :  { %v499_v50 = vadd.f32 %v498_v46, %v490_v33 }
 0x247   :  { %v1197_v48 = vpop.eup %1196 }
 0x248   :  { %v971_v49 = vmul.f32 0.6931472, %v1197_v48  ;;  %v977_v53 = vsub.f32 %v499_v50, %v976_v51 }
 0x24a   :  { %v972_v52 = vadd.f32 %v971_v49, %v963_v36 }
 0x24c   :  { %v978_v54 = vsub.f32 %v972_v52, %v976_v51 }
 0x24e   :  { %v979_v55 = vadd.f32 %v978_v54, %v977_v53 }
 0x250   :  { %v981_v56 = vsel %vm980_vm4, %v979_v55, 0.0 }
 0x251   :  { %982 = vadd.xlane.f32.xlu1 %v981_v56 }
 0x2de   :  { %v983_v57 = vpop.xlane.xlu1 %982 }
 0x2df   :  { %v984_v58 = vrot.slane %v983_v57, 4 }
 0x2e1   :  { %v985_v59 = vadd.f32 %v984_v58, %v983_v57 }
 0x2e3   :  { %v986_v60 = vrot.slane %v985_v59, 2 }
 0x2e5   :  { %v987_v61 = vadd.f32 %v986_v60, %v985_v59 }
 0x2e7   :  { %v988_v62 = vrot.slane %v987_v61, 1 }
 0x2e9   :  { %v989_v63 = vadd.f32 %v988_v62, %v987_v61 }
 0x2eb   :  { %1184 = vpush %v989_v63 }
 0x31c   :  { %s1185_s0 = spop %1184 }
 0x31d   :  { %992 = sst [smem:[#allocation2]] %s1185_s0 }
 0x31e   :  { %1207 = shalt.err (!%p1204_p2)
}
 0x31f   :  { %s1213_s17 = smov [#allocation2]  }
 0x320   :  { %1000 = dma.smem_to_hbm %s1213_s17, 16, %s1269_s1, [#allocation3]  }
 0x321   :  { %1208 = dma.done.wait [#allocation3], 16  }
 0x322   :  { %1209 = vsyncadd [#allocation3], 4294967280 }
 0x323   :  { %1004 = sfence }
 0x324   :  { %1005 = vsyncpa [#allocation3], 1 }

</bundles_post_ra>
